<compile_context>
chip_gen: v7x
topology: tpu7x:2x2x1
jax: 0.10.0
libtpu: 0.0.40
codegen_flags: <defaults>
</compile_context>

<pallas_src>
import functools

import jax
import jax.numpy as jnp
from jax.experimental import pallas as pl
from jax.experimental.pallas import tpu as pltpu

BN_EPS = 1e-5


def _round_up(x, m):
    return (x + m - 1) // m * m


# --------------------------------------------------------------------------------------
# Two-pass path kernels
# --------------------------------------------------------------------------------------
def _stats_fold_kernel(x_ref, w1_ref, gamma_ref, beta_ref,      # inputs
                       scale_ref, shift_ref,                    # outputs (written at last step)
                       sum_ref, ssq_ref,                        # VMEM scratch accumulators
                       *, n_rows, tile_n):
    """Accumulate per-feature sum / sum-of-squares of h = emb @ W1, then fold BN."""
    i = pl.program_id(0)

    @pl.when(i == 0)
    def _():
        sum_ref[...] = jnp.zeros_like(sum_ref)
        ssq_ref[...] = jnp.zeros_like(ssq_ref)

    # Mask rows of the ragged last tile (Pallas clips the DMA; padding rows are garbage).
    row = i * tile_n + jax.lax.broadcasted_iota(jnp.int32, (tile_n, 1), 0)
    x = jnp.where(row < n_rows, x_ref[...], 0.0).astype(jnp.bfloat16)

    h = jnp.dot(x, w1_ref[...], preferred_element_type=jnp.float32)
    sum_ref[...] += jnp.sum(h, axis=0, keepdims=True)
    ssq_ref[...] += jnp.sum(h * h, axis=0, keepdims=True)

    # Fold BatchNorm into scale/shift at the last grid step (removes an XLA dispatch).
    @pl.when(i == pl.num_programs(0) - 1)
    def _():
        inv_n = jnp.float32(1.0 / n_rows)
        mean = sum_ref[...] * inv_n
        var = jnp.maximum(ssq_ref[...] * inv_n - mean * mean, 0.0)  # biased var (BN default)
        scale = gamma_ref[...] * jax.lax.rsqrt(var + BN_EPS)
        scale_ref[...] = scale
        shift_ref[...] = beta_ref[...] - mean * scale


def _apply_kernel(x_ref, w1_ref, scale_ref, shift_ref, w2_ref, b2_ref, out_ref):
    """y = relu(relu((x @ W1) * scale + shift) @ W2 + b2).  No row mask needed: the
    ragged last tile's out-of-range rows are dropped by the clipped output DMA."""
    x = x_ref[...].astype(jnp.bfloat16)
    h = jnp.dot(x, w1_ref[...], preferred_element_type=jnp.float32)
    h = jnp.maximum(h * scale_ref[...] + shift_ref[...], 0.0)
    y = jnp.dot(h.astype(w2_ref.dtype), w2_ref[...],
                preferred_element_type=jnp.float32) + b2_ref[...]
    out_ref[...] = jnp.maximum(y, 0.0)


# --------------------------------------------------------------------------------------
# Fused single-call path (emb read from HBM exactly once)
# --------------------------------------------------------------------------------------
def _fused_kernel(x_ref, w1_ref, gamma_ref, beta_ref, w2_ref, b2_ref,   # inputs
                  out_ref,                                              # output
                  emb_store, sum_ref, ssq_ref, scale_ref, shift_ref,    # VMEM scratch
                  *, n_rows, tile_n):
    p = pl.program_id(0)              # phase: 0 = stats, 1 = apply
    i = pl.program_id(1)              # batch tile
    n_tiles = pl.num_programs(1)
    row0 = pl.multiple_of(i * tile_n, tile_n)

    @pl.when(p == 0)
    def _stats_phase():
        @pl.when(i == 0)
        def _():
            sum_ref[...] = jnp.zeros_like(sum_ref)
            ssq_ref[...] = jnp.zeros_like(ssq_ref)

        row = i * tile_n + jax.lax.broadcasted_iota(jnp.int32, (tile_n, 1), 0)
        x = jnp.where(row < n_rows, x_ref[...], 0.0).astype(jnp.bfloat16)
        emb_store[pl.ds(row0, tile_n), :] = x          # stash; reused in phase 1

        h = jnp.dot(x, w1_ref[...], preferred_element_type=jnp.float32)
        sum_ref[...] += jnp.sum(h, axis=0, keepdims=True)
        ssq_ref[...] += jnp.sum(h * h, axis=0, keepdims=True)

        @pl.when(i == n_tiles - 1)
        def _():
            inv_n = jnp.float32(1.0 / n_rows)
            mean = sum_ref[...] * inv_n
            var = jnp.maximum(ssq_ref[...] * inv_n - mean * mean, 0.0)
            s = gamma_ref[...] * jax.lax.rsqrt(var + BN_EPS)
            scale_ref[...] = s
            shift_ref[...] = beta_ref[...] - mean * s

    @pl.when(p == 1)
    def _apply_phase():
        x = emb_store[pl.ds(row0, tile_n), :]
        h = jnp.dot(x, w1_ref[...], preferred_element_type=jnp.float32)
        h = jnp.maximum(h * scale_ref[...] + shift_ref[...], 0.0)
        y = jnp.dot(h.astype(w2_ref.dtype), w2_ref[...],
                    preferred_element_type=jnp.float32) + b2_ref[...]
        out_ref[...] = jnp.maximum(y, 0.0)


# --------------------------------------------------------------------------------------
# Wrapper
# --------------------------------------------------------------------------------------
@functools.partial(jax.jit, static_argnames=("max_tile_n", "force_two_pass"))
def decoder1_forward(emb, params, *, max_tile_n=4096, force_two_pass=False):
    """emb: [N, nhid2] float32. params: dict of pre-transposed ([in, out]) weights."""
    w1 = params["w1"]        # [nhid2, nhid1]
    gamma = params["gamma"]  # [1, nhid1]
    beta = params["beta"]    # [1, nhid1]
    w2 = params["w2"]        # [nhid1, nfeat]
    b2 = params["b2"]        # [1, nfeat]
    # params["b1"] is intentionally unused: a bias added right before BatchNorm is
    # exactly cancelled by the batch-mean subtraction (dropping it is exact).

    n, nhid2 = emb.shape
    nhid1 = w1.shape[1]
    nfeat = w2.shape[1]
    nhid1_p = _round_up(nhid1, 128)            # lane-dense intermediate width
    f32, bf16 = jnp.float32, jnp.bfloat16

    # --- adaptive batch tile: big DMAs, near-equal tiles, bounded f32 intermediate ----
    cap = max(256, min(max_tile_n, (4 << 20) // (4 * nhid1_p)))   # h tile ~<= 4 MiB
    cap = max(8, (cap // 8) * 8)
    n_tiles = pl.cdiv(n, cap)
    tile_n = _round_up(pl.cdiv(n, n_tiles), 8)                    # near-equal tiles
    n_tiles = pl.cdiv(n, tile_n)

    # --- weights: zero-pad nhid1 -> nhid1_p; padded h columns stay exactly zero -------
    w1_p = jnp.pad(w1, ((0, 0), (0, nhid1_p - nhid1))).astype(bf16)
    gamma_p = jnp.pad(gamma.astype(f32), ((0, 0), (0, nhid1_p - nhid1)))
    beta_p = jnp.pad(beta.astype(f32), ((0, 0), (0, nhid1_p - nhid1)))
    w2_p = jnp.pad(w2, ((0, nhid1_p - nhid1), (0, 0))).astype(bf16)
    b2_p = b2.astype(f32)

    emb = emb.astype(f32)

    # --- decide fused vs two-pass (conservative VMEM budget, safe on v5e/v6e/v7x) -----
    stash_bytes = n_tiles * tile_n * nhid2 * 2                     # bf16 emb stash
    tile_bytes = 2 * tile_n * nhid2 * 4 + 2 * tile_n * nfeat * 4 + 4 * tile_n * nhid1_p * 4
    weight_bytes = 2 * (nhid2 * nhid1_p * 2 + nhid1_p * nfeat * 2) + 6 * nhid1_p * 4
    fuse = (not force_two_pass) and (stash_bytes + tile_bytes + weight_bytes) < (12 << 20)

    stat_spec = pl.BlockSpec((1, nhid1_p), lambda *idx: (0, 0))
    out_shape = jax.ShapeDtypeStruct((n, nfeat), f32)

    if fuse:
        # Single pallas_call: emb is read from HBM exactly once (phase 0); phase 1
        # reuses the bf16 VMEM stash.  In phase 1 the emb index_map pins the last
        # phase-0 block so no extra DMA is issued.
        out = pl.pallas_call(
            functools.partial(_fused_kernel, n_rows=n, tile_n=tile_n),
            out_shape=out_shape,
            grid=(2, n_tiles),
            in_specs=[
                pl.BlockSpec((tile_n, nhid2),
                             lambda p, i: ((1 - p) * i + p * (n_tiles - 1), 0)),
                pl.BlockSpec((nhid2, nhid1_p), lambda p, i: (0, 0)),
                pl.BlockSpec((1, nhid1_p), lambda p, i: (0, 0)),
                pl.BlockSpec((1, nhid1_p), lambda p, i: (0, 0)),
                pl.BlockSpec((nhid1_p, nfeat), lambda p, i: (0, 0)),
                pl.BlockSpec((1, nfeat), lambda p, i: (0, 0)),
            ],
            out_specs=pl.BlockSpec((tile_n, nfeat), lambda p, i: (p * i, 0)),
            scratch_shapes=[
                pltpu.VMEM((n_tiles * tile_n, nhid2), bf16),   # emb stash
                pltpu.VMEM((1, nhid1_p), f32),                 # sum
                pltpu.VMEM((1, nhid1_p), f32),                 # sum of squares
                pltpu.VMEM((1, nhid1_p), f32),                 # BN scale
                pltpu.VMEM((1, nhid1_p), f32),                 # BN shift
            ],
            compiler_params=pltpu.CompilerParams(
                dimension_semantics=("arbitrary", "arbitrary")),
        )(emb, w1_p, gamma_p, beta_p, w2_p, b2_p)
        return out

    # --- two-pass fallback (emb too big for a VMEM stash) ------------------------------
    # pass 1: full-batch statistics + in-kernel BN fold -> scale/shift
    scale, shift = pl.pallas_call(
        functools.partial(_stats_fold_kernel, n_rows=n, tile_n=tile_n),
        out_shape=(jax.ShapeDtypeStruct((1, nhid1_p), f32),
                   jax.ShapeDtypeStruct((1, nhid1_p), f32)),
        grid=(n_tiles,),
        in_specs=[
            pl.BlockSpec((tile_n, nhid2), lambda i: (i, 0)),
            pl.BlockSpec((nhid2, nhid1_p), lambda i: (0, 0)),
            stat_spec, stat_spec,
        ],
        out_specs=(stat_spec, stat_spec),
        scratch_shapes=[pltpu.VMEM((1, nhid1_p), f32),
                        pltpu.VMEM((1, nhid1_p), f32)],
        compiler_params=pltpu.CompilerParams(dimension_semantics=("arbitrary",)),
    )(emb, w1_p, gamma_p, beta_p)

    # pass 2: normalize + ReLU + Linear + ReLU, tiled & parallel over N
    out = pl.pallas_call(
        _apply_kernel,
        out_shape=out_shape,
        grid=(n_tiles,),
        in_specs=[
            pl.BlockSpec((tile_n, nhid2), lambda i: (i, 0)),
            pl.BlockSpec((nhid2, nhid1_p), lambda i: (0, 0)),
            stat_spec, stat_spec,
            pl.BlockSpec((nhid1_p, nfeat), lambda i: (0, 0)),
            pl.BlockSpec((1, nfeat), lambda i: (0, 0)),
        ],
        out_specs=pl.BlockSpec((tile_n, nfeat), lambda i: (i, 0)),
        compiler_params=pltpu.CompilerParams(
            dimension_semantics=("parallel",)),   # v7x splits N across its 2 TCs
    )(emb, w1_p, scale, shift, w2_p, b2_p)
    return out


# --------------------------------------------------------------------------------------
# Reference & test
# --------------------------------------------------------------------------------------
def init_params(key, nfeat, nhid1, nhid2):
    """Deterministic init mirroring PyTorch Linear defaults (U(-1/sqrt(fan_in), ...))."""
    k1, k2, k3, k4 = jax.random.split(key, 4)
    lim1 = 1.0 / jnp.sqrt(nhid2)
    lim2 = 1.0 / jnp.sqrt(nhid1)
    return {
        # stored as [in, out] (transposed vs. PyTorch's [out, in])
        "w1": jax.random.uniform(k1, (nhid2, nhid1), jnp.float32, -lim1, lim1),
        "b1": jax.random.uniform(k2, (1, nhid1), jnp.float32, -lim1, lim1),
        "gamma": jnp.ones((1, nhid1), jnp.float32),
        "beta": jnp.zeros((1, nhid1), jnp.float32),
        "w2": jax.random.uniform(k3, (nhid1, nfeat), jnp.float32, -lim2, lim2),
        "b2": jax.random.uniform(k4, (1, nfeat), jnp.float32, -lim2, lim2),
    }


def reference_forward(emb, params):
    """Pure-JAX f32 reference of the PyTorch module (b1 included; BN cancels it)."""
    h = emb @ params["w1"] + params["b1"]
    mean = jnp.mean(h, axis=0, keepdims=True)
    var = jnp.mean((h - mean) ** 2, axis=0, keepdims=True)
    h = (h - mean) / jnp.sqrt(var + BN_EPS)
    h = jnp.maximum(h * params["gamma"] + params["beta"], 0.0)
    y = h @ params["w2"] + params["b2"]
    return jnp.maximum(y, 0.0)


if __name__ == "__main__":
    # Small shapes implied by the module: emb is [batch, nhid2]
    N, nfeat, nhid1, nhid2 = 8, 16, 64, 32

    key = jax.random.PRNGKey(0)
    pkey, xkey = jax.random.split(key)
    params = init_params(pkey, nfeat, nhid1, nhid2)
    emb = jax.random.normal(xkey, (N, nhid2), jnp.float32)

    ref = reference_forward(emb, params)

    # Fused single-pass path (chosen automatically at this size).
    out_fused = jax.block_until_ready(decoder1_forward(emb, params))
    # Two-pass fallback path (exercised explicitly so both code paths are validated).
    out_two = jax.block_until_ready(decoder1_forward(emb, params, force_two_pass=True))

    assert out_fused.shape == (N, nfeat) and out_two.shape == (N, nfeat)
    # Tolerance accounts for bf16 matmul operands (f32 accumulation) vs. f32 reference.
    assert jnp.allclose(out_fused, ref, atol=3e-2, rtol=3e-2), \
        float(jnp.max(jnp.abs(out_fused - ref)))
    assert jnp.allclose(out_two, ref, atol=3e-2, rtol=3e-2), \
        float(jnp.max(jnp.abs(out_two - ref)))

    print("KERNEL_OK")
</pallas_src>

<mosaic_0001>
module attributes {stable_mosaic.version = 11 : i64} {
  func.func @_fused_kernel(%arg0: i32, %arg1: i32, %arg2: memref<8x32xf32, #tpu.memory_space<vmem>>, %arg3: memref<32x128xbf16, #tpu.memory_space<vmem>>, %arg4: memref<1x128xf32, #tpu.memory_space<vmem>>, %arg5: memref<1x128xf32, #tpu.memory_space<vmem>>, %arg6: memref<128x16xbf16, #tpu.memory_space<vmem>>, %arg7: memref<1x16xf32, #tpu.memory_space<vmem>>, %arg8: memref<8x16xf32, #tpu.memory_space<vmem>>, %arg9: memref<8x32xbf16, #tpu.memory_space<vmem>>, %arg10: memref<1x128xf32, #tpu.memory_space<vmem>>, %arg11: memref<1x128xf32, #tpu.memory_space<vmem>>, %arg12: memref<1x128xf32, #tpu.memory_space<vmem>>, %arg13: memref<1x128xf32, #tpu.memory_space<vmem>>) attributes {dimension_semantics = [#tpu.dimension_semantics<arbitrary>, #tpu.dimension_semantics<arbitrary>], iteration_bounds = array<i64: 2, 1>, scalar_prefetch = 0 : i64, scratch_operands = 5 : i64, tpu.core_type = #tpu.core_type<tc>, window_params = [{transform_indices = @transform_0, window_bounds = array<i64: 8, 32>}, {pipeline_mode = #tpu.pipeline_mode<synchronous>, transform_indices = @transform_1, window_bounds = array<i64: 32, 128>}, {pipeline_mode = #tpu.pipeline_mode<synchronous>, transform_indices = @transform_2, window_bounds = array<i64: 1, 128>}, {pipeline_mode = #tpu.pipeline_mode<synchronous>, transform_indices = @transform_3, window_bounds = array<i64: 1, 128>}, {pipeline_mode = #tpu.pipeline_mode<synchronous>, transform_indices = @transform_4, window_bounds = array<i64: 128, 16>}, {pipeline_mode = #tpu.pipeline_mode<synchronous>, transform_indices = @transform_5, window_bounds = array<i64: 1, 16>}, {transform_indices = @transform_6, window_bounds = array<i64: 8, 16>}]} {
    %c8_i32 = arith.constant 8 : i32
    %0 = arith.muli %arg1, %c8_i32 : i32
    %1 = tpu.assume_multiple %0, 8 : i32
    %c0_i32 = arith.constant 0 : i32
    %2 = arith.cmpi eq, %arg0, %c0_i32 : i32
    %3 = arith.extui %2 : i1 to i32
    %c0_i32_0 = arith.constant 0 : i32
    %4 = arith.cmpi ne, %3, %c0_i32_0 : i32
    scf.if %4 {
      %c0_i32_2 = arith.constant 0 : i32
      %8 = arith.cmpi eq, %arg1, %c0_i32_2 : i32
      %9 = arith.extui %8 : i1 to i32
      %c0_i32_3 = arith.constant 0 : i32
      %10 = arith.cmpi ne, %9, %c0_i32_3 : i32
      scf.if %10 {
        %cst_23 = arith.constant 0.000000e+00 : f32
        %41 = vector.broadcast %cst_23 : f32 to vector<1x128xf32>
        %c0_24 = arith.constant 0 : index
        %c0_25 = arith.constant 0 : index
        %42 = vector.load %arg10[%c0_24, %c0_25] : memref<1x128xf32, #tpu.memory_space<vmem>>, vector<1x128xf32>
        tpu.vector_store %arg10[%c0_24, %c0_25], %41 {strides = array<i32>} : memref<1x128xf32, #tpu.memory_space<vmem>>, vector<1x128xf32>,
        %cst_26 = arith.constant 0.000000e+00 : f32
        %43 = vector.broadcast %cst_26 : f32 to vector<1x128xf32>
        %c0_27 = arith.constant 0 : index
        %c0_28 = arith.constant 0 : index
        %44 = vector.load %arg11[%c0_27, %c0_28] : memref<1x128xf32, #tpu.memory_space<vmem>>, vector<1x128xf32>
        tpu.vector_store %arg11[%c0_27, %c0_28], %43 {strides = array<i32>} : memref<1x128xf32, #tpu.memory_space<vmem>>, vector<1x128xf32>,
      } else {
      }
      %c8_i32_4 = arith.constant 8 : i32
      %11 = arith.muli %arg1, %c8_i32_4 : i32
      %12 = tpu.iota {dimensions = array<i32: 0>} : vector<8x1xi32>
      %13 = vector.broadcast %11 : i32 to vector<8x1xi32>
      %14 = arith.addi %13, %12 : vector<8x1xi32>
      %c8_i32_5 = arith.constant 8 : i32
      %15 = vector.broadcast %c8_i32_5 : i32 to vector<8x1xi32>
      %16 = arith.cmpi slt, %14, %15 : vector<8x1xi32>
      %c0 = arith.constant 0 : index
      %c0_6 = arith.constant 0 : index
      %17 = vector.load %arg2[%c0, %c0_6] : memref<8x32xf32, #tpu.memory_space<vmem>>, vector<8x32xf32>
      %cst = arith.constant 0.000000e+00 : f32
      %18 = vector.shape_cast %16 : vector<8x1xi1> to vector<8x1xi1>
      %19 = vector.broadcast %18 : vector<8x1xi1> to vector<8x32xi1>
      %20 = vector.broadcast %cst : f32 to vector<8x32xf32>
      %21 = arith.select %19, %17, %20 : vector<8x32xi1>, vector<8x32xf32>
      %22 = arith.truncf %21 : vector<8x32xf32> to vector<8x32xbf16>
      %23 = arith.index_cast %1 : i32 to index
      %c0_7 = arith.constant 0 : index
      %24 = vector.load %arg9[%23, %c0_7] : memref<8x32xbf16, #tpu.memory_space<vmem>>, vector<8x32xbf16>
      tpu.vector_store %arg9[%23, %c0_7], %22 {strides = array<i32>} : memref<8x32xbf16, #tpu.memory_space<vmem>>, vector<8x32xbf16>,
      %c0_8 = arith.constant 0 : index
      %c0_9 = arith.constant 0 : index
      %25 = vector.load %arg3[%c0_8, %c0_9] : memref<32x128xbf16, #tpu.memory_space<vmem>>, vector<32x128xbf16>
      %cst_10 = arith.constant dense<0.000000e+00> : vector<8x128xf32>
      %26 = tpu.matmul %22, %25, %cst_10 {dimension_numbers = #tpu.dot_dimension_numbers<[1], [0], [0], [1], [0, 0, 1, 1], [], []>} : vector<8x32xbf16>, vector<32x128xbf16>, vector<8x128xf32> -> vector<8x128xf32>
      %c0_11 = arith.constant 0 : index
      %c0_12 = arith.constant 0 : index
      %27 = vector.load %arg10[%c0_11, %c0_12] : memref<1x128xf32, #tpu.memory_space<vmem>>, vector<1x128xf32>
      %cst_13 = arith.constant dense<0.000000e+00> : vector<128xf32>
      %28 = vector.multi_reduction <add>, %26, %cst_13 [0] : vector<8x128xf32> to vector<128xf32>
      %29 = vector.shape_cast %28 : vector<128xf32> to vector<1x128xf32>
      %30 = arith.addf %27, %29 : vector<1x128xf32>
      %c0_14 = arith.constant 0 : index
      %c0_15 = arith.constant 0 : index
      %31 = vector.load %arg10[%c0_14, %c0_15] : memref<1x128xf32, #tpu.memory_space<vmem>>, vector<1x128xf32>
      tpu.vector_store %arg10[%c0_14, %c0_15], %30 {strides = array<i32>} : memref<1x128xf32, #tpu.memory_space<vmem>>, vector<1x128xf32>,
      %c0_16 = arith.constant 0 : index
      %c0_17 = arith.constant 0 : index
      %32 = vector.load %arg11[%c0_16, %c0_17] : memref<1x128xf32, #tpu.memory_space<vmem>>, vector<1x128xf32>
      %33 = arith.mulf %26, %26 : vector<8x128xf32>
      %cst_18 = arith.constant dense<0.000000e+00> : vector<128xf32>
      %34 = vector.multi_reduction <add>, %33, %cst_18 [0] : vector<8x128xf32> to vector<128xf32>
      %35 = vector.shape_cast %34 : vector<128xf32> to vector<1x128xf32>
      %36 = arith.addf %32, %35 : vector<1x128xf32>
      %c0_19 = arith.constant 0 : index
      %c0_20 = arith.constant 0 : index
      %37 = vector.load %arg11[%c0_19, %c0_20] : memref<1x128xf32, #tpu.memory_space<vmem>>, vector<1x128xf32>
      tpu.vector_store %arg11[%c0_19, %c0_20], %36 {strides = array<i32>} : memref<1x128xf32, #tpu.memory_space<vmem>>, vector<1x128xf32>,
      %c0_i32_21 = arith.constant 0 : i32
      %38 = arith.cmpi eq, %arg1, %c0_i32_21 : i32
      %39 = arith.extui %38 : i1 to i32
      %c0_i32_22 = arith.constant 0 : i32
      %40 = arith.cmpi ne, %39, %c0_i32_22 : i32
      scf.if %40 {
        %c0_23 = arith.constant 0 : index
        %c0_24 = arith.constant 0 : index
        %41 = vector.load %arg10[%c0_23, %c0_24] : memref<1x128xf32, #tpu.memory_space<vmem>>, vector<1x128xf32>
        %cst_25 = arith.constant 1.250000e-01 : f32
        %42 = vector.broadcast %cst_25 : f32 to vector<1x128xf32>
        %43 = arith.mulf %41, %42 : vector<1x128xf32>
        %c0_26 = arith.constant 0 : index
        %c0_27 = arith.constant 0 : index
        %44 = vector.load %arg11[%c0_26, %c0_27] : memref<1x128xf32, #tpu.memory_space<vmem>>, vector<1x128xf32>
        %cst_28 = arith.constant 1.250000e-01 : f32
        %45 = vector.broadcast %cst_28 : f32 to vector<1x128xf32>
        %46 = arith.mulf %44, %45 : vector<1x128xf32>
        %47 = arith.mulf %43, %43 : vector<1x128xf32>
        %48 = arith.subf %46, %47 : vector<1x128xf32>
        %cst_29 = arith.constant 0.000000e+00 : f32
        %49 = vector.broadcast %cst_29 : f32 to vector<1x128xf32>
        %50 = arith.maximumf %48, %49 : vector<1x128xf32>
        %c0_30 = arith.constant 0 : index
        %c0_31 = arith.constant 0 : index
        %51 = vector.load %arg4[%c0_30, %c0_31] : memref<1x128xf32, #tpu.memory_space<vmem>>, vector<1x128xf32>
        %cst_32 = arith.constant 9.99999974E-6 : f32
        %52 = vector.broadcast %cst_32 : f32 to vector<1x128xf32>
        %53 = arith.addf %50, %52 : vector<1x128xf32>
        %54 = math.rsqrt %53 : vector<1x128xf32>
        %55 = arith.mulf %51, %54 : vector<1x128xf32>
        %c0_33 = arith.constant 0 : index
        %c0_34 = arith.constant 0 : index
        %56 = vector.load %arg12[%c0_33, %c0_34] : memref<1x128xf32, #tpu.memory_space<vmem>>, vector<1x128xf32>
        tpu.vector_store %arg12[%c0_33, %c0_34], %55 {strides = array<i32>} : memref<1x128xf32, #tpu.memory_space<vmem>>, vector<1x128xf32>,
        %c0_35 = arith.constant 0 : index
        %c0_36 = arith.constant 0 : index
        %57 = vector.load %arg5[%c0_35, %c0_36] : memref<1x128xf32, #tpu.memory_space<vmem>>, vector<1x128xf32>
        %58 = arith.mulf %43, %55 : vector<1x128xf32>
        %59 = arith.subf %57, %58 : vector<1x128xf32>
        %c0_37 = arith.constant 0 : index
        %c0_38 = arith.constant 0 : index
        %60 = vector.load %arg13[%c0_37, %c0_38] : memref<1x128xf32, #tpu.memory_space<vmem>>, vector<1x128xf32>
        tpu.vector_store %arg13[%c0_37, %c0_38], %59 {strides = array<i32>} : memref<1x128xf32, #tpu.memory_space<vmem>>, vector<1x128xf32>,
      } else {
      }
    } else {
    }
    %c1_i32 = arith.constant 1 : i32
    %5 = arith.cmpi eq, %arg0, %c1_i32 : i32
    %6 = arith.extui %5 : i1 to i32
    %c0_i32_1 = arith.constant 0 : i32
    %7 = arith.cmpi ne, %6, %c0_i32_1 : i32
    scf.if %7 {
      %8 = arith.index_cast %1 : i32 to index
      %c0 = arith.constant 0 : index
      %9 = vector.load %arg9[%8, %c0] : memref<8x32xbf16, #tpu.memory_space<vmem>>, vector<8x32xbf16>
      %c0_2 = arith.constant 0 : index
      %c0_3 = arith.constant 0 : index
      %10 = vector.load %arg3[%c0_2, %c0_3] : memref<32x128xbf16, #tpu.memory_space<vmem>>, vector<32x128xbf16>
      %cst = arith.constant dense<0.000000e+00> : vector<8x128xf32>
      %11 = tpu.matmul %9, %10, %cst {dimension_numbers = #tpu.dot_dimension_numbers<[1], [0], [0], [1], [0, 0, 1, 1], [], []>} : vector<8x32xbf16>, vector<32x128xbf16>, vector<8x128xf32> -> vector<8x128xf32>
      %c0_4 = arith.constant 0 : index
      %c0_5 = arith.constant 0 : index
      %12 = vector.load %arg12[%c0_4, %c0_5] : memref<1x128xf32, #tpu.memory_space<vmem>>, vector<1x128xf32>
      %13 = vector.broadcast %12 : vector<1x128xf32> to vector<8x128xf32>
      %14 = arith.mulf %11, %13 : vector<8x128xf32>
      %c0_6 = arith.constant 0 : index
      %c0_7 = arith.constant 0 : index
      %15 = vector.load %arg13[%c0_6, %c0_7] : memref<1x128xf32, #tpu.memory_space<vmem>>, vector<1x128xf32>
      %16 = vector.broadcast %15 : vector<1x128xf32> to vector<8x128xf32>
      %17 = arith.addf %14, %16 : vector<8x128xf32>
      %cst_8 = arith.constant 0.000000e+00 : f32
      %18 = vector.broadcast %cst_8 : f32 to vector<8x128xf32>
      %19 = arith.maximumf %17, %18 : vector<8x128xf32>
      %20 = arith.truncf %19 : vector<8x128xf32> to vector<8x128xbf16>
      %c0_9 = arith.constant 0 : index
      %c0_10 = arith.constant 0 : index
      %21 = vector.load %arg6[%c0_9, %c0_10] : memref<128x16xbf16, #tpu.memory_space<vmem>>, vector<128x16xbf16>
      %cst_11 = arith.constant dense<0.000000e+00> : vector<8x16xf32>
      %22 = tpu.matmul %20, %21, %cst_11 {dimension_numbers = #tpu.dot_dimension_numbers<[1], [0], [0], [1], [0, 0, 1, 1], [], []>} : vector<8x128xbf16>, vector<128x16xbf16>, vector<8x16xf32> -> vector<8x16xf32>
      %c0_12 = arith.constant 0 : index
      %c0_13 = arith.constant 0 : index
      %23 = vector.load %arg7[%c0_12, %c0_13] : memref<1x16xf32, #tpu.memory_space<vmem>>, vector<1x16xf32>
      %24 = vector.broadcast %23 : vector<1x16xf32> to vector<8x16xf32>
      %25 = arith.addf %22, %24 : vector<8x16xf32>
      %cst_14 = arith.constant 0.000000e+00 : f32
      %26 = vector.broadcast %cst_14 : f32 to vector<8x16xf32>
      %27 = arith.maximumf %25, %26 : vector<8x16xf32>
      %c0_15 = arith.constant 0 : index
      %c0_16 = arith.constant 0 : index
      %28 = vector.load %arg8[%c0_15, %c0_16] : memref<8x16xf32, #tpu.memory_space<vmem>>, vector<8x16xf32>
      tpu.vector_store %arg8[%c0_15, %c0_16], %27 {strides = array<i32>} : memref<8x16xf32, #tpu.memory_space<vmem>>, vector<8x16xf32>,
    } else {
    }
    return
  }
  func.func @transform_0(%arg0: i32, %arg1: i32) -> (i32, i32) {
    %c1_i32 = arith.constant 1 : i32
    %0 = arith.subi %c1_i32, %arg0 : i32
    %1 = arith.muli %0, %arg1 : i32
    %c0_i32 = arith.constant 0 : i32
    %2 = arith.muli %arg0, %c0_i32 : i32
    %3 = arith.addi %1, %2 : i32
    %c0_i32_0 = arith.constant 0 : i32
    %c0_i32_1 = arith.constant 0 : i32
    return %3, %c0_i32_0 : i32, i32
  }
  func.func @transform_1(%arg0: i32, %arg1: i32) -> (i32, i32) {
    %c0_i32 = arith.constant 0 : i32
    %c0_i32_0 = arith.constant 0 : i32
    %c0_i32_1 = arith.constant 0 : i32
    return %c0_i32, %c0_i32_0 : i32, i32
  }
  func.func @transform_2(%arg0: i32, %arg1: i32) -> (i32, i32) {
    %c0_i32 = arith.constant 0 : i32
    %c0_i32_0 = arith.constant 0 : i32
    %c0_i32_1 = arith.constant 0 : i32
    return %c0_i32, %c0_i32_0 : i32, i32
  }
  func.func @transform_3(%arg0: i32, %arg1: i32) -> (i32, i32) {
    %c0_i32 = arith.constant 0 : i32
    %c0_i32_0 = arith.constant 0 : i32
    %c0_i32_1 = arith.constant 0 : i32
    return %c0_i32, %c0_i32_0 : i32, i32
  }
  func.func @transform_4(%arg0: i32, %arg1: i32) -> (i32, i32) {
    %c0_i32 = arith.constant 0 : i32
    %c0_i32_0 = arith.constant 0 : i32
    %c0_i32_1 = arith.constant 0 : i32
    return %c0_i32, %c0_i32_0 : i32, i32
  }
  func.func @transform_5(%arg0: i32, %arg1: i32) -> (i32, i32) {
    %c0_i32 = arith.constant 0 : i32
    %c0_i32_0 = arith.constant 0 : i32
    %c0_i32_1 = arith.constant 0 : i32
    return %c0_i32, %c0_i32_0 : i32, i32
  }
  func.func @transform_6(%arg0: i32, %arg1: i32) -> (i32, i32) {
    %0 = arith.muli %arg0, %arg1 : i32
    %c0_i32 = arith.constant 0 : i32
    %c0_i32_0 = arith.constant 0 : i32
    return %0, %c0_i32 : i32, i32
  }
}

</mosaic_0001>

<bundles_post_ra>
// kernel: decoder1_forward.1
= control target key start
LH: loop header
LB: loop body
LE: loop exit
PB: predicated region body
PF: predicated region fallthrough
CT: control target
= control target key end

     0   :  { %11 = vsyncpa [#allocation8], 0  ;;  %s1025_s0 = inlined_call_operand.vmem [shape: f32[8,32], index: 0, kind: input, shape index: {}]   ;;  %s1026_s1 = inlined_call_operand.vmem [shape: bf16[32,128], index: 1, kind: input, shape index: {}]   ;;  %s1027_s2 = inlined_call_operand.vmem [shape: f32[1,128], index: 2, kind: input, shape index: {}]   ;;  %s1028_s3 = inlined_call_operand.vmem [shape: f32[1,128], index: 3, kind: input, shape index: {}]   ;;  %s1029_s4 = inlined_call_operand.vmem [shape: bf16[128,16], index: 4, kind: input, shape index: {}]   ;;  %s1030_s5 = inlined_call_operand.vmem [shape: f32[1,16], index: 5, kind: input, shape index: {}]   ;;  %s1031_s6 = inlined_call_operand.hbm [shape: f32[8,16], index: 6, kind: output, shape index: {}]  }
   0x1   :  { %13 = vsyncpa [#allocation8 + $0x1], 0  ;;  %s917_s21 = smov 0   ;;  %s919_s22 = smov 0  }
   0x2   :  { %s921_s23 = smov 0  }
   0x3 LB: > { %s689_s24 = sadd.s32 4294967295, %s875_s23   ;;  %s690_s25 = sadd.s32 4294967294, %s875_s23   ;;  %s875_s23 = sphi %s921_s23, %s19_s23   ;;  %s871_s22 = sphi %s919_s22, %s1034_s22   ;;  %s867_s21 = sphi %s917_s21, %s1033_s21  }
   0x4   : > { %s31_s26 = sadd.s32 1, %s871_s22  ;;  %p694_p0 = scmp.ge.s32.totalorder %s875_s23, 1 }
   0x5   : > { %p33_p1 = scmp.ge.s32.totalorder %s31_s26, 2  ;;  %p236_p2 = scmp.lt.s32.totalorder %s875_s23, 3 }
   0x7   : > { %s1036_s26 = smov (%p33_p1, %s31_s26), 0  ;;  %p237_p3 = pnand %p694_p0, %p236_p2 }
   0x8   : > { %p695_p4 = scmp.ne.s32.totalorder (!%p237_p3), %s867_s21, 0 }
   0x9   : > { %240 = sbr.rel (%p237_p3) target bundleno = 757 (0x2f5), region = 44 }
  0x10   : > { %281 = sbr.rel (%p695_p4) target bundleno = 287 (0x11f), region = 48  ;;  %v809_v0 = vld [vmem:[%s1026_s1] sm:$0xff] (!%p695_p4)   ;;  %v877_v1 = vmov (!%p695_p4), 0.0   ;;  %v810_v2 = vld [vmem:[%s1026_s1 + $0x8] sm:$0xff] (!%p695_p4)   ;;  %vm878_vm0 = vmmov (!%p695_p4), 0   ;;  %vm302_vm1 = vcmask (!%p695_p4), 257024  }
  0x11   : > { %286 = vst [vmem:[#allocation3] sm:$0x1] (!%p695_p4), %v877_v1  ;;  %287 = vst [vmem:[#allocation4] sm:$0x1] (!%p695_p4), %v877_v1  ;;  %733 = vmatprep.subr.bf16.mxu0 (!%p695_p4), %v877_v1  ;;  %737 = vmatprep.mubr.msk.bf16.mxu0 (!%p695_p4), %vm878_vm0, %v877_v1  ;;  %v293_v3 = vld [vmem:[%s1025_s0] sm:$0xff] (!%p695_p4)  ;;  %vm320_vm2 = vcmask (!%p695_p4), 261120  }
  0x12   : > { %734 = vmatpush3.bf16.msra.mxu0 (!%p695_p4), %v809_v0  ;;  %v297_v4 = vpack.c.bf16 (!%p695_p4), %v293_v3, %v293_v3  ;;  %v393_v34 = vld [vmem:[%s1027_s2] sm:$0x1] (!%p695_p4) }
  0x13   : > { %735 = vmatprep.subr.bf16.mxu0 (!%p695_p4), %v877_v1  ;;  %v398_v37 = vld [vmem:[%s1028_s3] sm:$0x1] (!%p695_p4) }
  0x14   : > { %303 = vst.msk [vmem:[#allocation2] sm:$0xf] (!%p695_p4), %vm302_vm1, %v297_v4 }
  0x16   : > { %736 = vmatpush3.bf16.msra.mxu0 (!%p695_p4), %v810_v2 }
  0x18   : > { %v364_v19 = vld [vmem:[#allocation3] sm:$0x1]  ;;  %v373_v22 = vld [vmem:[#allocation4] sm:$0x1] }
  0x19   : > { %738 = vmatmul.mubr.msk.bf16.vlgmr.msra.gmra.mrb[0].mxu0 %vm320_vm2, %v297_v4 }
  0xec   : > { %v358_v5 = vpop.f32.mrb[0].mxu0 }
  0xed   : > { %v365_v6 = vrot.slane %v358_v5, 4  ;;  %v374_v7 = vmul.f32 %v358_v5, %v358_v5  ;;  %v739_v8 = vpop.f32.mrb[1].mxu0 }
  0xee   : > { %v361_v9 = vpop.f32.mrb[2].mxu0 }
  0xef   : > { %v366_v10 = vadd.f32 %v365_v6, %v358_v5  ;;  %v375_v11 = vrot.slane %v374_v7, 4  ;;  %v740_v12 = vpop.f32.mrb[3].mxu0 }
  0xf1   : > { %v367_v13 = vrot.slane %v366_v10, 2  ;;  %v376_v14 = vadd.f32 %v375_v11, %v374_v7 }
  0xf3   : > { %v368_v15 = vadd.f32 %v367_v13, %v366_v10  ;;  %v377_v16 = vrot.slane %v376_v14, 2 }
  0xf5   : > { %v369_v17 = vrot.slane %v368_v15, 1  ;;  %v378_v18 = vadd.f32 %v377_v16, %v376_v14 }
  0xf7   : > { %v370_v20 = vadd.f32 %v369_v17, %v368_v15  ;;  %v379_v21 = vrot.slane %v378_v18, 1 }
  0xf9   : > { %v371_v23 = vadd.f32 %v370_v20, %v364_v19  ;;  %v380_v24 = vadd.f32 %v379_v21, %v378_v18 }
  0xfb   : > { %372 = vst [vmem:[#allocation3] sm:$0x1] %v371_v23  ;;  %v381_v25 = vadd.f32 %v380_v24, %v373_v22 }
  0xfd   : > { %382 = vst [vmem:[#allocation4] sm:$0x1] %v381_v25 }
 0x102   : > { %v386_v26 = vld [vmem:[#allocation3] sm:$0x1] }
 0x103   : > { %v387_v27 = vmul.f32 0.125, %v386_v26 }
 0x104   : > { %v388_v28 = vld [vmem:[#allocation4] sm:$0x1] }
 0x105   : > { %v389_v29 = vmul.f32 0.125, %v388_v28  ;;  %v390_v30 = vmul.f32 %v387_v27, %v387_v27 }
 0x107   : > { %v391_v31 = vsub.f32 %v389_v29, %v390_v30 }
 0x109   : > { %v392_v32 = vmax.f32 %v391_v31, 0.0 }
 0x10b   : > { %v394_v33 = vadd.f32 1e-05, %v392_v32 }
 0x10d   : > { %811 = vrsqrt.f32 %v394_v33 }
 0x117   : > { %v812_v35 = vpop.eup %811 }
 0x118   : > { %v396_v36 = vmul.f32 %v812_v35, %v393_v34 }
 0x11a   : > { %397 = vst [vmem:[#allocation5] sm:$0x1] %v396_v36  ;;  %v399_v38 = vmul.f32 %v396_v36, %v387_v27 }
 0x11c   : > { %v400_v39 = vsub.f32 %v398_v37, %v399_v38 }
 0x11e   : > { %401 = vst [vmem:[#allocation6] sm:$0x1] %v400_v39 }
 0x11f PF: > { %p699_p5 = scmp.ne.s32.totalorder %s867_s21, 1 }
 0x120   : > { %v813_v40 = vld [vmem:[%s1026_s1] sm:$0xff] (!%p699_p5)   ;;  %v879_v41 = vmov (!%p699_p5), 0.0   ;;  %v814_v42 = vld [vmem:[%s1026_s1 + $0x8] sm:$0xff] (!%p699_p5)   ;;  %vm880_vm3 = vmmov (!%p699_p5), 0   ;;  %vm427_vm4 = vcmask (!%p699_p5), 261120   ;;  %v817_v46 = vld [vmem:[%s1029_s4 + $0x10] sm:$0xff] (!%p699_p5)  }
 0x121   : > { %405 = sbr.rel (%p699_p5) target bundleno = 734 (0x2de), region = 60  ;;  %741 = vmatprep.subr.bf16.mxu0 (!%p699_p5), %v879_v41  ;;  %749 = vmatprep.subr.bf16.mxu1 (!%p699_p5), %v879_v41  ;;  %v815_v43 = vld [vmem:[%s1029_s4] sm:$0xff] (!%p699_p5)   ;;  %v816_v44 = vld [vmem:[%s1029_s4 + $0x8] sm:$0xff] (!%p699_p5)   ;;  %v818_v47 = vld [vmem:[%s1029_s4 + $0x18] sm:$0xff] (!%p699_p5)   ;;  %vm601_vm5 = vcmask (!%p699_p5), 130048  }
 0x122   : > { %742 = vmatpush3.bf16.msra.mxu0 (!%p699_p5), %v813_v40  ;;  %745 = vmatprep.mubr.msk.bf16.mxu0 (!%p699_p5), %vm880_vm3, %v879_v41  ;;  %v819_v48 = vld [vmem:[%s1029_s4 + $0x20] sm:$0xff] (!%p699_p5)   ;;  %v820_v49 = vld [vmem:[%s1029_s4 + $0x28] sm:$0xff] (!%p699_p5)   ;;  %v821_v50 = vld [vmem:[%s1029_s4 + $0x30] sm:$0xff] (!%p699_p5)  }
 0x123   : > { %743 = vmatprep.subr.bf16.mxu0 (!%p699_p5), %v879_v41  ;;  %765 = vmatprep.mubr.msk.bf16.mxu1 (!%p699_p5), %vm880_vm3, %v879_v41  ;;  %v410_v45 = vld [vmem:[#allocation2] sm:$0xf] (!%p699_p5)  ;;  %v822_v51 = vld [vmem:[%s1029_s4 + $0x38] sm:$0xff] (!%p699_p5)   ;;  %v703_v52 = vld [vmem:[#allocation5] ss:$0 sm:$0xff] (!%p699_p5) }
 0x124   : > { %750 = vmatpush3.bf16.msra.mxu1 (!%p699_p5), %v815_v43  ;;  %v705_v62 = vld [vmem:[%s1030_s5] ss:$0 sm:$0xff] (!%p699_p5) }
 0x125   : > { %751 = vmatprep.subr.bf16.mxu1 (!%p699_p5), %v879_v41  ;;  %v704_v54 = vld [vmem:[#allocation6] ss:$0 sm:$0xff] (!%p699_p5) }
 0x126   : > { %744 = vmatpush3.bf16.msra.mxu0 (!%p699_p5), %v814_v42 }
 0x128   : > { %752 = vmatpush3.bf16.msra.mxu1 %v816_v44 }
 0x129   : > { %746 = vmatmul.mubr.msk.bf16.vlgmr.msra.gmra.mrb[0].mxu0 %vm427_vm4, %v410_v45  ;;  %753 = vmatprep.subr.bf16.mxu1 %v879_v41 }
 0x12c   : > { %754 = vmatpush3.bf16.msra.mxu1 %v817_v46 }
 0x12d   : > { %755 = vmatprep.subr.bf16.mxu1 %v879_v41 }
 0x130   : > { %756 = vmatpush3.bf16.msra.mxu1 %v818_v47 }
 0x131   : > { %757 = vmatprep.subr.bf16.mxu1 %v879_v41 }
 0x134   : > { %758 = vmatpush3.bf16.msra.mxu1 %v819_v48 }
 0x135   : > { %759 = vmatprep.subr.bf16.mxu1 %v879_v41 }
 0x138   : > { %760 = vmatpush3.bf16.msra.mxu1 %v820_v49 }
 0x139   : > { %761 = vmatprep.subr.bf16.mxu1 %v879_v41 }
 0x13c   : > { %762 = vmatpush3.bf16.msra.mxu1 %v821_v50 }
 0x13d   : > { %763 = vmatprep.subr.bf16.mxu1 %v879_v41 }
 0x140   : > { %764 = vmatpush3.bf16.msra.mxu1 %v822_v51 }
 0x1fc   : > { %v465_v53 = vpop.f32.mrb[0].mxu0 }
 0x1fd   : > { %v478_v55 = vmul.f32 %v703_v52, %v465_v53  ;;  %v747_v56 = vpop.f32.mrb[1].mxu0 }
 0x1fe   : > { %v468_v57 = vpop.f32.mrb[2].mxu0 }
 0x1ff   : > { %v486_v58 = vadd.f32 %v704_v54, %v478_v55  ;;  %v748_v59 = vpop.f32.mrb[3].mxu0 }
 0x201   : > { %v487_v60 = vmax.f32 %v486_v58, 0.0 }
 0x203   : > { %v488_v61 = vpack.c.bf16 %v487_v60, %v487_v60 }
 0x205   : > { %766 = vmatmul.mubr.bf16.vlgmr.msra.gmra.mrb[0].mxu1 %v488_v61 }
 0x2d8   : > { %v594_v63 = vpop.f32.mrb[0].mxu1 }
 0x2d9   : > { %v595_v0 = vadd.f32 %v705_v62, %v594_v63  ;;  %v767_v1 = vpop.f32.mrb[1].mxu1 }
 0x2da   : > { %v597_v2 = vpop.f32.mrb[2].mxu1 }
 0x2db   : > { %v600_v3 = vmax.f32 %v595_v0, 0.0  ;;  %v768_v4 = vpop.f32.mrb[3].mxu1 }
 0x2dd   : > { %602 = vst.msk [vmem:[#allocation7] sm:$0xff] %vm601_vm5, %v600_v3 }
 0x2de PF: > { %p991_p6 = scmp.eq.s32.totalorder %s689_s24, 1  ;;  %s881_s17 = smov [#allocation7]  }
 0x2df   : > { %s618_s18 = sshll.u32 %s881_s17, 4  ;;  %s619_s18 = int_to_ptr.vmem [resolvable:$true] %s618_s18 }
 0x2e0   : > { %s823_s19 = scalar_lea.vmem %s619_s18, 128  ;;  %s829_s20 = scalar_lea.vmem %s619_s18, 256 }
 0x2e1   : > { %p824_p7 = scmp.ne.s32.totalorder %s619_s18, %s823_s19  ;;  %p830_p10 = scmp.lt.s32.totalorder %s619_s18, %s619_s18 }
 0x2e2   : > { %p831_p11 = scmp.lt.s32.totalorder %s829_s20, %s823_s19 }
 0x2e3   : > { %p825_p8 = pnand %p824_p7, %p991_p6 }
 0x2e4   : > { %p832_p12 = por %p831_p11, %p830_p10 }
 0x2e5   : > { %p826_p9 = pneg %p825_p8 }
 0x2e7   : > { %p833_p13 = pnand %p832_p12, %p826_p9 }
 0x2e9   : > { %836 = shalt.err (!%p833_p13)
}
 0x2ea   : > { %s837_s27 = scalar_lea.hbm %s1031_s6, 128 }
 0x2eb   : > { %p838_p0 = scmp.ne.s32.totalorder %s1031_s6, %s837_s27  ;;  %p843_p3 = scmp.lt.u32.totalorder %s837_s27, %s1031_s6 }
 0x2ed   : > { %p839_p1 = pnand %p838_p0, %p991_p6 }
 0x2ef   : > { %p840_p2 = pneg %p839_p1 }
 0x2f1   : > { %p845_p4 = pnand %p843_p3, %p840_p2 }
 0x2f3   : > { %848 = shalt.err (!%p845_p4)
}
 0x2f4   : > { %770 = dma.vmem_to_hbm [thread:$0]  (%p991_p6), %s619_s18, 128, %s1031_s6, [#allocation8]  }
 0x2f5 PF: > { %p778_p5 = scmp.ge.s32.totalorder %s875_s23, 2  ;;  %p779_p7 = scmp.eq.s32.totalorder %s690_s25, 1 }
 0x2f7   : > { %p774_p8 = pnand %p779_p7, %p778_p5 }
 0x2f9   : > { %862 = dma.done.wait (!%p774_p8), [#allocation8], 128  }
 0x2fa   : > { %864 = vsyncadd (!%p774_p8), [#allocation8], 4294967168  ;;  %s19_s23 = sadd.s32 1, %s875_s23   ;;  %s1033_s21 = smov %s871_s22 }
 0x2fb   : > { %p16_p9 = scmp.ge.s32.totalorder %s19_s23, 4   ;;  %s1034_s22 = smov %s1036_s26 }
 0x2fd   :  { %18 = sbr.rel (!%p16_p9) target bundleno = 3 (0x3), region = 97 }
 0x304   :  { %636 = vsyncpa [#allocation8], 1 }
 0x305   :  { %638 = vsyncpa [#allocation8 + $0x1], 1 }

</bundles_post_ra>
